<compile_context>
chip_gen: v6e
topology: v6e:2x2x1
jax: 0.10.0
libtpu: 0.0.40
codegen_flags: <defaults>
</compile_context>

<pallas_src>
import math
from functools import partial

import numpy as np
import jax
import jax.numpy as jnp
from jax import lax
from jax.experimental import pallas as pl
from jax.experimental.pallas import tpu as pltpu


# ---------------------------------------------------------------------------
# Gaussian window construction (mirrors torch `gaussian`)
# ---------------------------------------------------------------------------
def gaussian_1d(window_size: int, sigma: float):
    g = [math.exp(-((x - window_size // 2) ** 2) / float(2 * sigma ** 2))
         for x in range(window_size)]
    s = sum(g)
    return [v / s for v in g]


def _banded_gaussian_matrix(n: int, g) -> np.ndarray:
    """(n, n) banded matrix M with the conv zero padding folded in.

    Horizontal pass:  out = plane @ M   (out[i, j] = sum_a plane[i, a] * M[a, j])
    Vertical pass:    out = M.T @ tmp
    """
    win = len(g)
    pad = win // 2
    m = np.zeros((n, n), dtype=np.float32)
    for j in range(n):
        for a in range(max(0, j - pad), min(n, j + pad + 1)):
            m[a, j] = g[a - j + pad]
    return m


# ---------------------------------------------------------------------------
# VMEM planning
# ---------------------------------------------------------------------------
def _vmem_capacity_bytes() -> int:
    try:
        info = pltpu.get_tpu_info()
        cap = int(getattr(info, "vmem_capacity_bytes", 0))
        if cap > 0:
            return cap
    except Exception:
        pass
    return 64 << 20          # conservative default (v7x per-TensorCore)


def _block_vmem_bytes(p: int, H: int, W: int) -> int:
    """Conservative per-grid-step VMEM estimate for a chunk of p planes."""
    plane = p * H * W * 4
    inputs = 2 * 2 * plane              # x, y blocks, double-buffered by the pipeline
    h_temps = 5 * plane                 # five horizontal-pass results held across the plane loop
    transients = 3 * plane              # x*x, y*y, x*y matmul operands
    per_plane = 14 * H * W * 4          # vertical results + epilogue temps of one plane
    consts = 2 * (H * H + W * W) * 4    # gw + gh, double-buffered
    out = 2 * p * H * 4                 # (P*H, 1) row-sum output block
    scratch = 2 << 20                   # compiler-internal scratch headroom
    return inputs + h_temps + transients + per_plane + consts + out + scratch


def _choose_planes_per_block(N: int, H: int, W: int, budget_bytes: int) -> int:
    """Largest plane chunk that fits the budget, obeys the (8,128) sublane rule,
    and prefers an even (>= 2) grid-step count for v7x megacore balance."""
    def tiling_ok(p):
        return (p * H) % 8 == 0 or p == N

    divisors = [p for p in range(1, N + 1) if N % p == 0]
    fitting = [p for p in divisors
               if tiling_ok(p) and _block_vmem_bytes(p, H, W) <= budget_bytes]
    if not fitting:
        # Fall back to the SMALLEST tiling-legal chunk (never blow the budget
        # by grabbing the whole input).
        # TODO(synk): switch to halo'd strips when even P=1 overflows VMEM.
        legal = [p for p in divisors if tiling_ok(p)]
        return min(legal) if legal else N

    even_steps = [p for p in fitting if (N // p) >= 2 and (N // p) % 2 == 0]
    if even_steps:
        return max(even_steps)
    multi_steps = [p for p in fitting if N // p >= 2]
    if multi_steps:
        return max(multi_steps)
    return max(fitting)


# ---------------------------------------------------------------------------
# Pallas kernel: per-plane SSIM row sums for a chunk of P image planes
# ---------------------------------------------------------------------------
def _ssim_rowsum_kernel(x_ref, y_ref, gw_ref, gh_ref, o_ref, *, P, H, W):
    f32 = jnp.float32
    x = x_ref[...].astype(f32)          # (P*H, W): P planes stacked along sublanes
    y = y_ref[...].astype(f32)
    gw = gw_ref[...]                    # (W, W) banded Gaussian -> horizontal RHS
    gh = gh_ref[...]                    # (H, H) banded Gaussian (transposed) -> vertical LHS

    # Horizontal pass: one matmul per moment plane over the full P-plane stack.
    # gw stays resident as the MXU RHS; no concatenate temp.
    t_x = jnp.dot(x, gw, preferred_element_type=f32)
    t_y = jnp.dot(y, gw, preferred_element_type=f32)
    t_xx = jnp.dot(x * x, gw, preferred_element_type=f32)
    t_yy = jnp.dot(y * y, gw, preferred_element_type=f32)
    t_xy = jnp.dot(x * y, gw, preferred_element_type=f32)

    C1 = 0.01 ** 2
    C2 = 0.03 ** 2

    # Vertical pass + epilogue per plane. gh is only (H, H) (no Kronecker
    # blow-up); slices start at p*H which is sublane-aligned whenever H % 8 == 0.
    for p in range(P):                  # static unroll over the plane chunk
        lo = p * H
        mu1 = jnp.dot(gh, t_x[lo:lo + H, :], preferred_element_type=f32)
        mu2 = jnp.dot(gh, t_y[lo:lo + H, :], preferred_element_type=f32)
        e_xx = jnp.dot(gh, t_xx[lo:lo + H, :], preferred_element_type=f32)
        e_yy = jnp.dot(gh, t_yy[lo:lo + H, :], preferred_element_type=f32)
        e_xy = jnp.dot(gh, t_xy[lo:lo + H, :], preferred_element_type=f32)

        mu1_sq = mu1 * mu1
        mu2_sq = mu2 * mu2
        mu1_mu2 = mu1 * mu2
        sigma1_sq = e_xx - mu1_sq
        sigma2_sq = e_yy - mu2_sq
        sigma12 = e_xy - mu1_mu2

        num = (2.0 * mu1_mu2 + C1) * (2.0 * sigma12 + C2)
        den = (mu1_sq + mu2_sq + C1) * (sigma1_sq + sigma2_sq + C2)
        ssim_p = num / den                                    # (H, W), exact divide

        # Reduce the lane axis (W) first on the 2D layout; store tiny row sums.
        o_ref[lo:lo + H, :] = jnp.sum(ssim_p, axis=1, keepdims=True)


# ---------------------------------------------------------------------------
# Wrapper
# ---------------------------------------------------------------------------
def ssim_pallas(img1, img2, window_size: int = 11, size_average: bool = True):
    assert img1.shape == img2.shape and img1.ndim == 4
    assert window_size % 2 == 1, "banded-Gaussian symmetry assumes an odd window"
    B, C, H, W = img1.shape
    N = B * C

    g = gaussian_1d(window_size, 1.5)
    gw = jnp.asarray(_banded_gaussian_matrix(W, g))           # (W, W) horizontal RHS
    gh = jnp.asarray(_banded_gaussian_matrix(H, g).T)         # (H, H) vertical LHS

    cap = _vmem_capacity_bytes()
    plan_budget = min(cap // 2, 64 << 20)     # ~32 MiB on v7x, up to 64 MiB on v5e/v6e

    if 2 * (H * H + W * W) * 4 > plan_budget:
        # TODO(synk): halo'd row/column strips with sliced banded Gh/Gw.
        raise NotImplementedError(
            "image too large for whole-plane banded filtering; needs strip tiling")

    P = _choose_planes_per_block(N, H, W, plan_budget)
    num_blocks = N // P

    # Free row-major reshapes: no padded HBM copies are materialized.
    x2d = img1.reshape(N * H, W)
    y2d = img2.reshape(N * H, W)

    est = _block_vmem_bytes(P, H, W)
    cap_limit = min(int(0.72 * cap), 100 << 20)   # <=~46 MiB on v7x, <=100 MiB on v5e/v6e
    vmem_limit = int(min(max(est, 16 << 20), cap_limit))

    flops = 10 * N * H * W * (W + H) + 20 * N * H * W
    bytes_accessed = (2 * N * H * W * img1.dtype.itemsize
                      + N * H * 4
                      + num_blocks * (H * H + W * W) * 4)

    kernel = partial(_ssim_rowsum_kernel, P=P, H=H, W=W)

    row_sums = pl.pallas_call(
        kernel,
        out_shape=jax.ShapeDtypeStruct((N * H, 1), jnp.float32),
        grid_spec=pltpu.PrefetchScalarGridSpec(
            num_scalar_prefetch=0,
            grid=(num_blocks,),
            in_specs=[
                pl.BlockSpec((P * H, W), lambda i: (i, 0)),
                pl.BlockSpec((P * H, W), lambda i: (i, 0)),
                pl.BlockSpec((W, W), lambda i: (0, 0)),       # constant across grid
                pl.BlockSpec((H, H), lambda i: (0, 0)),       # constant across grid
            ],
            out_specs=pl.BlockSpec((P * H, 1), lambda i: (i, 0)),
        ),
        compiler_params=pltpu.CompilerParams(
            dimension_semantics=("parallel",),
            vmem_limit_bytes=vmem_limit,
        ),
        cost_estimate=pl.CostEstimate(
            flops=flops, transcendentals=0, bytes_accessed=bytes_accessed),
    )(x2d, y2d, gw, gh)

    # Tiny plain-JAX epilogue: per-(batch, channel) sums -> mean(s).
    sums = jnp.sum(row_sums.reshape(B, C, H), axis=2)
    if size_average:
        return jnp.sum(sums) / jnp.float32(B * C * H * W)
    return jnp.sum(sums, axis=1) / jnp.float32(C * H * W)


# ---------------------------------------------------------------------------
# Pure-JAX reference (mirrors PyTorch _ssim exactly via grouped conv2d)
# ---------------------------------------------------------------------------
def _ssim_reference(img1, img2, window_size=11, size_average=True):
    B, C, H, W = img1.shape
    g = jnp.asarray(gaussian_1d(window_size, 1.5), dtype=jnp.float32)
    w2d = jnp.outer(g, g)
    window = jnp.broadcast_to(w2d, (C, 1, window_size, window_size))
    pad = window_size // 2

    def conv(x):
        return lax.conv_general_dilated(
            x, window, window_strides=(1, 1),
            padding=((pad, pad), (pad, pad)),
            dimension_numbers=("NCHW", "OIHW", "NCHW"),
            feature_group_count=C)

    mu1, mu2 = conv(img1), conv(img2)
    mu1_sq, mu2_sq, mu1_mu2 = mu1 ** 2, mu2 ** 2, mu1 * mu2
    sigma1_sq = conv(img1 * img1) - mu1_sq
    sigma2_sq = conv(img2 * img2) - mu2_sq
    sigma12 = conv(img1 * img2) - mu1_mu2
    C1, C2 = 0.01 ** 2, 0.03 ** 2
    ssim_map = ((2 * mu1_mu2 + C1) * (2 * sigma12 + C2)) / (
        (mu1_sq + mu2_sq + C1) * (sigma1_sq + sigma2_sq + C2))
    if size_average:
        return ssim_map.mean()
    return ssim_map.mean(axis=(1, 2, 3))


if __name__ == "__main__":
    key = jax.random.PRNGKey(0)
    k1, k2 = jax.random.split(key)
    B, C, H, W = 2, 4, 16, 16
    img1 = jax.random.uniform(k1, (B, C, H, W), dtype=jnp.float32)
    img2 = jax.random.uniform(k2, (B, C, H, W), dtype=jnp.float32)

    out = jax.block_until_ready(
        ssim_pallas(img1, img2, window_size=11, size_average=True))
    ref = _ssim_reference(img1, img2, window_size=11, size_average=True)
    assert jnp.allclose(out, ref, rtol=1e-4, atol=1e-5), (out, ref)

    out_b = jax.block_until_ready(
        ssim_pallas(img1, img2, window_size=11, size_average=False))
    ref_b = _ssim_reference(img1, img2, window_size=11, size_average=False)
    assert jnp.allclose(out_b, ref_b, rtol=1e-4, atol=1e-5), (out_b, ref_b)

    print("KERNEL_OK")
</pallas_src>

<mosaic_0001>
module attributes {stable_mosaic.version = 11 : i64} {
  func.func @_ssim_rowsum_kernel(%arg0: i32, %arg1: memref<64x16xf32, #tpu.memory_space<vmem>>, %arg2: memref<64x16xf32, #tpu.memory_space<vmem>>, %arg3: memref<16x16xf32, #tpu.memory_space<vmem>>, %arg4: memref<16x16xf32, #tpu.memory_space<vmem>>, %arg5: memref<64x1xf32, #tpu.memory_space<vmem>>) attributes {dimension_semantics = [#tpu.dimension_semantics<parallel>], iteration_bounds = array<i64: 2>, scalar_prefetch = 0 : i64, scratch_operands = 0 : i64, tpu.core_type = #tpu.core_type<tc>, window_params = [{transform_indices = @transform_0, window_bounds = array<i64: 64, 16>}, {transform_indices = @transform_1, window_bounds = array<i64: 64, 16>}, {pipeline_mode = #tpu.pipeline_mode<synchronous>, transform_indices = @transform_2, window_bounds = array<i64: 16, 16>}, {pipeline_mode = #tpu.pipeline_mode<synchronous>, transform_indices = @transform_3, window_bounds = array<i64: 16, 16>}, {transform_indices = @transform_4, window_bounds = array<i64: 64, 1>}]} {
    %c0 = arith.constant 0 : index
    %c0_0 = arith.constant 0 : index
    %0 = vector.load %arg1[%c0, %c0_0] : memref<64x16xf32, #tpu.memory_space<vmem>>, vector<64x16xf32>
    %c0_1 = arith.constant 0 : index
    %c0_2 = arith.constant 0 : index
    %1 = vector.load %arg2[%c0_1, %c0_2] : memref<64x16xf32, #tpu.memory_space<vmem>>, vector<64x16xf32>
    %c0_3 = arith.constant 0 : index
    %c0_4 = arith.constant 0 : index
    %2 = vector.load %arg3[%c0_3, %c0_4] : memref<16x16xf32, #tpu.memory_space<vmem>>, vector<16x16xf32>
    %c0_5 = arith.constant 0 : index
    %c0_6 = arith.constant 0 : index
    %3 = vector.load %arg4[%c0_5, %c0_6] : memref<16x16xf32, #tpu.memory_space<vmem>>, vector<16x16xf32>
    %cst = arith.constant dense<0.000000e+00> : vector<64x16xf32>
    %4 = tpu.matmul %0, %2, %cst {dimension_numbers = #tpu.dot_dimension_numbers<[1], [0], [0], [1], [0, 0, 1, 1], [], []>} : vector<64x16xf32>, vector<16x16xf32>, vector<64x16xf32> -> vector<64x16xf32>
    %cst_7 = arith.constant dense<0.000000e+00> : vector<64x16xf32>
    %5 = tpu.matmul %1, %2, %cst_7 {dimension_numbers = #tpu.dot_dimension_numbers<[1], [0], [0], [1], [0, 0, 1, 1], [], []>} : vector<64x16xf32>, vector<16x16xf32>, vector<64x16xf32> -> vector<64x16xf32>
    %6 = arith.mulf %0, %0 : vector<64x16xf32>
    %cst_8 = arith.constant dense<0.000000e+00> : vector<64x16xf32>
    %7 = tpu.matmul %6, %2, %cst_8 {dimension_numbers = #tpu.dot_dimension_numbers<[1], [0], [0], [1], [0, 0, 1, 1], [], []>} : vector<64x16xf32>, vector<16x16xf32>, vector<64x16xf32> -> vector<64x16xf32>
    %8 = arith.mulf %1, %1 : vector<64x16xf32>
    %cst_9 = arith.constant dense<0.000000e+00> : vector<64x16xf32>
    %9 = tpu.matmul %8, %2, %cst_9 {dimension_numbers = #tpu.dot_dimension_numbers<[1], [0], [0], [1], [0, 0, 1, 1], [], []>} : vector<64x16xf32>, vector<16x16xf32>, vector<64x16xf32> -> vector<64x16xf32>
    %10 = arith.mulf %0, %1 : vector<64x16xf32>
    %cst_10 = arith.constant dense<0.000000e+00> : vector<64x16xf32>
    %11 = tpu.matmul %10, %2, %cst_10 {dimension_numbers = #tpu.dot_dimension_numbers<[1], [0], [0], [1], [0, 0, 1, 1], [], []>} : vector<64x16xf32>, vector<16x16xf32>, vector<64x16xf32> -> vector<64x16xf32>
    %12 = vector.extract_strided_slice %4 {offsets = [0, 0], sizes = [16, 16], strides = [1, 1]} : vector<64x16xf32> to vector<16x16xf32>
    %cst_11 = arith.constant dense<0.000000e+00> : vector<16x16xf32>
    %13 = tpu.matmul %3, %12, %cst_11 {dimension_numbers = #tpu.dot_dimension_numbers<[1], [0], [0], [1], [0, 0, 1, 1], [], []>} : vector<16x16xf32>, vector<16x16xf32>, vector<16x16xf32> -> vector<16x16xf32>
    %14 = vector.extract_strided_slice %5 {offsets = [0, 0], sizes = [16, 16], strides = [1, 1]} : vector<64x16xf32> to vector<16x16xf32>
    %cst_12 = arith.constant dense<0.000000e+00> : vector<16x16xf32>
    %15 = tpu.matmul %3, %14, %cst_12 {dimension_numbers = #tpu.dot_dimension_numbers<[1], [0], [0], [1], [0, 0, 1, 1], [], []>} : vector<16x16xf32>, vector<16x16xf32>, vector<16x16xf32> -> vector<16x16xf32>
    %16 = vector.extract_strided_slice %7 {offsets = [0, 0], sizes = [16, 16], strides = [1, 1]} : vector<64x16xf32> to vector<16x16xf32>
    %cst_13 = arith.constant dense<0.000000e+00> : vector<16x16xf32>
    %17 = tpu.matmul %3, %16, %cst_13 {dimension_numbers = #tpu.dot_dimension_numbers<[1], [0], [0], [1], [0, 0, 1, 1], [], []>} : vector<16x16xf32>, vector<16x16xf32>, vector<16x16xf32> -> vector<16x16xf32>
    %18 = vector.extract_strided_slice %9 {offsets = [0, 0], sizes = [16, 16], strides = [1, 1]} : vector<64x16xf32> to vector<16x16xf32>
    %cst_14 = arith.constant dense<0.000000e+00> : vector<16x16xf32>
    %19 = tpu.matmul %3, %18, %cst_14 {dimension_numbers = #tpu.dot_dimension_numbers<[1], [0], [0], [1], [0, 0, 1, 1], [], []>} : vector<16x16xf32>, vector<16x16xf32>, vector<16x16xf32> -> vector<16x16xf32>
    %20 = vector.extract_strided_slice %11 {offsets = [0, 0], sizes = [16, 16], strides = [1, 1]} : vector<64x16xf32> to vector<16x16xf32>
    %cst_15 = arith.constant dense<0.000000e+00> : vector<16x16xf32>
    %21 = tpu.matmul %3, %20, %cst_15 {dimension_numbers = #tpu.dot_dimension_numbers<[1], [0], [0], [1], [0, 0, 1, 1], [], []>} : vector<16x16xf32>, vector<16x16xf32>, vector<16x16xf32> -> vector<16x16xf32>
    %22 = arith.mulf %13, %13 : vector<16x16xf32>
    %23 = arith.mulf %15, %15 : vector<16x16xf32>
    %24 = arith.mulf %13, %15 : vector<16x16xf32>
    %25 = arith.subf %17, %22 : vector<16x16xf32>
    %26 = arith.subf %19, %23 : vector<16x16xf32>
    %27 = arith.subf %21, %24 : vector<16x16xf32>
    %cst_16 = arith.constant 2.000000e+00 : f32
    %28 = vector.broadcast %cst_16 : f32 to vector<16x16xf32>
    %29 = arith.mulf %28, %24 : vector<16x16xf32>
    %cst_17 = arith.constant 9.99999974E-5 : f32
    %30 = vector.broadcast %cst_17 : f32 to vector<16x16xf32>
    %31 = arith.addf %29, %30 : vector<16x16xf32>
    %cst_18 = arith.constant 2.000000e+00 : f32
    %32 = vector.broadcast %cst_18 : f32 to vector<16x16xf32>
    %33 = arith.mulf %32, %27 : vector<16x16xf32>
    %cst_19 = arith.constant 8.99999984E-4 : f32
    %34 = vector.broadcast %cst_19 : f32 to vector<16x16xf32>
    %35 = arith.addf %33, %34 : vector<16x16xf32>
    %36 = arith.mulf %31, %35 : vector<16x16xf32>
    %37 = arith.addf %22, %23 : vector<16x16xf32>
    %cst_20 = arith.constant 9.99999974E-5 : f32
    %38 = vector.broadcast %cst_20 : f32 to vector<16x16xf32>
    %39 = arith.addf %37, %38 : vector<16x16xf32>
    %40 = arith.addf %25, %26 : vector<16x16xf32>
    %cst_21 = arith.constant 8.99999984E-4 : f32
    %41 = vector.broadcast %cst_21 : f32 to vector<16x16xf32>
    %42 = arith.addf %40, %41 : vector<16x16xf32>
    %43 = arith.mulf %39, %42 : vector<16x16xf32>
    %44 = arith.divf %36, %43 : vector<16x16xf32>
    %cst_22 = arith.constant dense<0.000000e+00> : vector<16xf32>
    %45 = vector.multi_reduction <add>, %44, %cst_22 [1] : vector<16x16xf32> to vector<16xf32>
    %46 = vector.shape_cast %45 : vector<16xf32> to vector<16x1xf32>
    %c0_23 = arith.constant 0 : index
    %c0_24 = arith.constant 0 : index
    %47 = vector.load %arg5[%c0_23, %c0_24] : memref<64x1xf32, #tpu.memory_space<vmem>>, vector<16x1xf32>
    tpu.vector_store %arg5[%c0_23, %c0_24], %46 {strides = array<i32>} : memref<64x1xf32, #tpu.memory_space<vmem>>, vector<16x1xf32>,
    %48 = vector.extract_strided_slice %4 {offsets = [16, 0], sizes = [16, 16], strides = [1, 1]} : vector<64x16xf32> to vector<16x16xf32>
    %cst_25 = arith.constant dense<0.000000e+00> : vector<16x16xf32>
    %49 = tpu.matmul %3, %48, %cst_25 {dimension_numbers = #tpu.dot_dimension_numbers<[1], [0], [0], [1], [0, 0, 1, 1], [], []>} : vector<16x16xf32>, vector<16x16xf32>, vector<16x16xf32> -> vector<16x16xf32>
    %50 = vector.extract_strided_slice %5 {offsets = [16, 0], sizes = [16, 16], strides = [1, 1]} : vector<64x16xf32> to vector<16x16xf32>
    %cst_26 = arith.constant dense<0.000000e+00> : vector<16x16xf32>
    %51 = tpu.matmul %3, %50, %cst_26 {dimension_numbers = #tpu.dot_dimension_numbers<[1], [0], [0], [1], [0, 0, 1, 1], [], []>} : vector<16x16xf32>, vector<16x16xf32>, vector<16x16xf32> -> vector<16x16xf32>
    %52 = vector.extract_strided_slice %7 {offsets = [16, 0], sizes = [16, 16], strides = [1, 1]} : vector<64x16xf32> to vector<16x16xf32>
    %cst_27 = arith.constant dense<0.000000e+00> : vector<16x16xf32>
    %53 = tpu.matmul %3, %52, %cst_27 {dimension_numbers = #tpu.dot_dimension_numbers<[1], [0], [0], [1], [0, 0, 1, 1], [], []>} : vector<16x16xf32>, vector<16x16xf32>, vector<16x16xf32> -> vector<16x16xf32>
    %54 = vector.extract_strided_slice %9 {offsets = [16, 0], sizes = [16, 16], strides = [1, 1]} : vector<64x16xf32> to vector<16x16xf32>
    %cst_28 = arith.constant dense<0.000000e+00> : vector<16x16xf32>
    %55 = tpu.matmul %3, %54, %cst_28 {dimension_numbers = #tpu.dot_dimension_numbers<[1], [0], [0], [1], [0, 0, 1, 1], [], []>} : vector<16x16xf32>, vector<16x16xf32>, vector<16x16xf32> -> vector<16x16xf32>
    %56 = vector.extract_strided_slice %11 {offsets = [16, 0], sizes = [16, 16], strides = [1, 1]} : vector<64x16xf32> to vector<16x16xf32>
    %cst_29 = arith.constant dense<0.000000e+00> : vector<16x16xf32>
    %57 = tpu.matmul %3, %56, %cst_29 {dimension_numbers = #tpu.dot_dimension_numbers<[1], [0], [0], [1], [0, 0, 1, 1], [], []>} : vector<16x16xf32>, vector<16x16xf32>, vector<16x16xf32> -> vector<16x16xf32>
    %58 = arith.mulf %49, %49 : vector<16x16xf32>
    %59 = arith.mulf %51, %51 : vector<16x16xf32>
    %60 = arith.mulf %49, %51 : vector<16x16xf32>
    %61 = arith.subf %53, %58 : vector<16x16xf32>
    %62 = arith.subf %55, %59 : vector<16x16xf32>
    %63 = arith.subf %57, %60 : vector<16x16xf32>
    %cst_30 = arith.constant 2.000000e+00 : f32
    %64 = vector.broadcast %cst_30 : f32 to vector<16x16xf32>
    %65 = arith.mulf %64, %60 : vector<16x16xf32>
    %cst_31 = arith.constant 9.99999974E-5 : f32
    %66 = vector.broadcast %cst_31 : f32 to vector<16x16xf32>
    %67 = arith.addf %65, %66 : vector<16x16xf32>
    %cst_32 = arith.constant 2.000000e+00 : f32
    %68 = vector.broadcast %cst_32 : f32 to vector<16x16xf32>
    %69 = arith.mulf %68, %63 : vector<16x16xf32>
    %cst_33 = arith.constant 8.99999984E-4 : f32
    %70 = vector.broadcast %cst_33 : f32 to vector<16x16xf32>
    %71 = arith.addf %69, %70 : vector<16x16xf32>
    %72 = arith.mulf %67, %71 : vector<16x16xf32>
    %73 = arith.addf %58, %59 : vector<16x16xf32>
    %cst_34 = arith.constant 9.99999974E-5 : f32
    %74 = vector.broadcast %cst_34 : f32 to vector<16x16xf32>
    %75 = arith.addf %73, %74 : vector<16x16xf32>
    %76 = arith.addf %61, %62 : vector<16x16xf32>
    %cst_35 = arith.constant 8.99999984E-4 : f32
    %77 = vector.broadcast %cst_35 : f32 to vector<16x16xf32>
    %78 = arith.addf %76, %77 : vector<16x16xf32>
    %79 = arith.mulf %75, %78 : vector<16x16xf32>
    %80 = arith.divf %72, %79 : vector<16x16xf32>
    %cst_36 = arith.constant dense<0.000000e+00> : vector<16xf32>
    %81 = vector.multi_reduction <add>, %80, %cst_36 [1] : vector<16x16xf32> to vector<16xf32>
    %82 = vector.shape_cast %81 : vector<16xf32> to vector<16x1xf32>
    %c16 = arith.constant 16 : index
    %c0_37 = arith.constant 0 : index
    %83 = vector.load %arg5[%c16, %c0_37] : memref<64x1xf32, #tpu.memory_space<vmem>>, vector<16x1xf32>
    tpu.vector_store %arg5[%c16, %c0_37], %82 {strides = array<i32>} : memref<64x1xf32, #tpu.memory_space<vmem>>, vector<16x1xf32>,
    %84 = vector.extract_strided_slice %4 {offsets = [32, 0], sizes = [16, 16], strides = [1, 1]} : vector<64x16xf32> to vector<16x16xf32>
    %cst_38 = arith.constant dense<0.000000e+00> : vector<16x16xf32>
    %85 = tpu.matmul %3, %84, %cst_38 {dimension_numbers = #tpu.dot_dimension_numbers<[1], [0], [0], [1], [0, 0, 1, 1], [], []>} : vector<16x16xf32>, vector<16x16xf32>, vector<16x16xf32> -> vector<16x16xf32>
    %86 = vector.extract_strided_slice %5 {offsets = [32, 0], sizes = [16, 16], strides = [1, 1]} : vector<64x16xf32> to vector<16x16xf32>
    %cst_39 = arith.constant dense<0.000000e+00> : vector<16x16xf32>
    %87 = tpu.matmul %3, %86, %cst_39 {dimension_numbers = #tpu.dot_dimension_numbers<[1], [0], [0], [1], [0, 0, 1, 1], [], []>} : vector<16x16xf32>, vector<16x16xf32>, vector<16x16xf32> -> vector<16x16xf32>
    %88 = vector.extract_strided_slice %7 {offsets = [32, 0], sizes = [16, 16], strides = [1, 1]} : vector<64x16xf32> to vector<16x16xf32>
    %cst_40 = arith.constant dense<0.000000e+00> : vector<16x16xf32>
    %89 = tpu.matmul %3, %88, %cst_40 {dimension_numbers = #tpu.dot_dimension_numbers<[1], [0], [0], [1], [0, 0, 1, 1], [], []>} : vector<16x16xf32>, vector<16x16xf32>, vector<16x16xf32> -> vector<16x16xf32>
    %90 = vector.extract_strided_slice %9 {offsets = [32, 0], sizes = [16, 16], strides = [1, 1]} : vector<64x16xf32> to vector<16x16xf32>
    %cst_41 = arith.constant dense<0.000000e+00> : vector<16x16xf32>
    %91 = tpu.matmul %3, %90, %cst_41 {dimension_numbers = #tpu.dot_dimension_numbers<[1], [0], [0], [1], [0, 0, 1, 1], [], []>} : vector<16x16xf32>, vector<16x16xf32>, vector<16x16xf32> -> vector<16x16xf32>
    %92 = vector.extract_strided_slice %11 {offsets = [32, 0], sizes = [16, 16], strides = [1, 1]} : vector<64x16xf32> to vector<16x16xf32>
    %cst_42 = arith.constant dense<0.000000e+00> : vector<16x16xf32>
    %93 = tpu.matmul %3, %92, %cst_42 {dimension_numbers = #tpu.dot_dimension_numbers<[1], [0], [0], [1], [0, 0, 1, 1], [], []>} : vector<16x16xf32>, vector<16x16xf32>, vector<16x16xf32> -> vector<16x16xf32>
    %94 = arith.mulf %85, %85 : vector<16x16xf32>
    %95 = arith.mulf %87, %87 : vector<16x16xf32>
    %96 = arith.mulf %85, %87 : vector<16x16xf32>
    %97 = arith.subf %89, %94 : vector<16x16xf32>
    %98 = arith.subf %91, %95 : vector<16x16xf32>
    %99 = arith.subf %93, %96 : vector<16x16xf32>
    %cst_43 = arith.constant 2.000000e+00 : f32
    %100 = vector.broadcast %cst_43 : f32 to vector<16x16xf32>
    %101 = arith.mulf %100, %96 : vector<16x16xf32>
    %cst_44 = arith.constant 9.99999974E-5 : f32
    %102 = vector.broadcast %cst_44 : f32 to vector<16x16xf32>
    %103 = arith.addf %101, %102 : vector<16x16xf32>
    %cst_45 = arith.constant 2.000000e+00 : f32
    %104 = vector.broadcast %cst_45 : f32 to vector<16x16xf32>
    %105 = arith.mulf %104, %99 : vector<16x16xf32>
    %cst_46 = arith.constant 8.99999984E-4 : f32
    %106 = vector.broadcast %cst_46 : f32 to vector<16x16xf32>
    %107 = arith.addf %105, %106 : vector<16x16xf32>
    %108 = arith.mulf %103, %107 : vector<16x16xf32>
    %109 = arith.addf %94, %95 : vector<16x16xf32>
    %cst_47 = arith.constant 9.99999974E-5 : f32
    %110 = vector.broadcast %cst_47 : f32 to vector<16x16xf32>
    %111 = arith.addf %109, %110 : vector<16x16xf32>
    %112 = arith.addf %97, %98 : vector<16x16xf32>
    %cst_48 = arith.constant 8.99999984E-4 : f32
    %113 = vector.broadcast %cst_48 : f32 to vector<16x16xf32>
    %114 = arith.addf %112, %113 : vector<16x16xf32>
    %115 = arith.mulf %111, %114 : vector<16x16xf32>
    %116 = arith.divf %108, %115 : vector<16x16xf32>
    %cst_49 = arith.constant dense<0.000000e+00> : vector<16xf32>
    %117 = vector.multi_reduction <add>, %116, %cst_49 [1] : vector<16x16xf32> to vector<16xf32>
    %118 = vector.shape_cast %117 : vector<16xf32> to vector<16x1xf32>
    %c32 = arith.constant 32 : index
    %c0_50 = arith.constant 0 : index
    %119 = vector.load %arg5[%c32, %c0_50] : memref<64x1xf32, #tpu.memory_space<vmem>>, vector<16x1xf32>
    tpu.vector_store %arg5[%c32, %c0_50], %118 {strides = array<i32>} : memref<64x1xf32, #tpu.memory_space<vmem>>, vector<16x1xf32>,
    %120 = vector.extract_strided_slice %4 {offsets = [48, 0], sizes = [16, 16], strides = [1, 1]} : vector<64x16xf32> to vector<16x16xf32>
    %cst_51 = arith.constant dense<0.000000e+00> : vector<16x16xf32>
    %121 = tpu.matmul %3, %120, %cst_51 {dimension_numbers = #tpu.dot_dimension_numbers<[1], [0], [0], [1], [0, 0, 1, 1], [], []>} : vector<16x16xf32>, vector<16x16xf32>, vector<16x16xf32> -> vector<16x16xf32>
    %122 = vector.extract_strided_slice %5 {offsets = [48, 0], sizes = [16, 16], strides = [1, 1]} : vector<64x16xf32> to vector<16x16xf32>
    %cst_52 = arith.constant dense<0.000000e+00> : vector<16x16xf32>
    %123 = tpu.matmul %3, %122, %cst_52 {dimension_numbers = #tpu.dot_dimension_numbers<[1], [0], [0], [1], [0, 0, 1, 1], [], []>} : vector<16x16xf32>, vector<16x16xf32>, vector<16x16xf32> -> vector<16x16xf32>
    %124 = vector.extract_strided_slice %7 {offsets = [48, 0], sizes = [16, 16], strides = [1, 1]} : vector<64x16xf32> to vector<16x16xf32>
    %cst_53 = arith.constant dense<0.000000e+00> : vector<16x16xf32>
    %125 = tpu.matmul %3, %124, %cst_53 {dimension_numbers = #tpu.dot_dimension_numbers<[1], [0], [0], [1], [0, 0, 1, 1], [], []>} : vector<16x16xf32>, vector<16x16xf32>, vector<16x16xf32> -> vector<16x16xf32>
    %126 = vector.extract_strided_slice %9 {offsets = [48, 0], sizes = [16, 16], strides = [1, 1]} : vector<64x16xf32> to vector<16x16xf32>
    %cst_54 = arith.constant dense<0.000000e+00> : vector<16x16xf32>
    %127 = tpu.matmul %3, %126, %cst_54 {dimension_numbers = #tpu.dot_dimension_numbers<[1], [0], [0], [1], [0, 0, 1, 1], [], []>} : vector<16x16xf32>, vector<16x16xf32>, vector<16x16xf32> -> vector<16x16xf32>
    %128 = vector.extract_strided_slice %11 {offsets = [48, 0], sizes = [16, 16], strides = [1, 1]} : vector<64x16xf32> to vector<16x16xf32>
    %cst_55 = arith.constant dense<0.000000e+00> : vector<16x16xf32>
    %129 = tpu.matmul %3, %128, %cst_55 {dimension_numbers = #tpu.dot_dimension_numbers<[1], [0], [0], [1], [0, 0, 1, 1], [], []>} : vector<16x16xf32>, vector<16x16xf32>, vector<16x16xf32> -> vector<16x16xf32>
    %130 = arith.mulf %121, %121 : vector<16x16xf32>
    %131 = arith.mulf %123, %123 : vector<16x16xf32>
    %132 = arith.mulf %121, %123 : vector<16x16xf32>
    %133 = arith.subf %125, %130 : vector<16x16xf32>
    %134 = arith.subf %127, %131 : vector<16x16xf32>
    %135 = arith.subf %129, %132 : vector<16x16xf32>
    %cst_56 = arith.constant 2.000000e+00 : f32
    %136 = vector.broadcast %cst_56 : f32 to vector<16x16xf32>
    %137 = arith.mulf %136, %132 : vector<16x16xf32>
    %cst_57 = arith.constant 9.99999974E-5 : f32
    %138 = vector.broadcast %cst_57 : f32 to vector<16x16xf32>
    %139 = arith.addf %137, %138 : vector<16x16xf32>
    %cst_58 = arith.constant 2.000000e+00 : f32
    %140 = vector.broadcast %cst_58 : f32 to vector<16x16xf32>
    %141 = arith.mulf %140, %135 : vector<16x16xf32>
    %cst_59 = arith.constant 8.99999984E-4 : f32
    %142 = vector.broadcast %cst_59 : f32 to vector<16x16xf32>
    %143 = arith.addf %141, %142 : vector<16x16xf32>
    %144 = arith.mulf %139, %143 : vector<16x16xf32>
    %145 = arith.addf %130, %131 : vector<16x16xf32>
    %cst_60 = arith.constant 9.99999974E-5 : f32
    %146 = vector.broadcast %cst_60 : f32 to vector<16x16xf32>
    %147 = arith.addf %145, %146 : vector<16x16xf32>
    %148 = arith.addf %133, %134 : vector<16x16xf32>
    %cst_61 = arith.constant 8.99999984E-4 : f32
    %149 = vector.broadcast %cst_61 : f32 to vector<16x16xf32>
    %150 = arith.addf %148, %149 : vector<16x16xf32>
    %151 = arith.mulf %147, %150 : vector<16x16xf32>
    %152 = arith.divf %144, %151 : vector<16x16xf32>
    %cst_62 = arith.constant dense<0.000000e+00> : vector<16xf32>
    %153 = vector.multi_reduction <add>, %152, %cst_62 [1] : vector<16x16xf32> to vector<16xf32>
    %154 = vector.shape_cast %153 : vector<16xf32> to vector<16x1xf32>
    %c48 = arith.constant 48 : index
    %c0_63 = arith.constant 0 : index
    %155 = vector.load %arg5[%c48, %c0_63] : memref<64x1xf32, #tpu.memory_space<vmem>>, vector<16x1xf32>
    tpu.vector_store %arg5[%c48, %c0_63], %154 {strides = array<i32>} : memref<64x1xf32, #tpu.memory_space<vmem>>, vector<16x1xf32>,
    return
  }
  func.func @transform_0(%arg0: i32) -> (i32, i32) {
    %c0_i32 = arith.constant 0 : i32
    %c0_i32_0 = arith.constant 0 : i32
    return %arg0, %c0_i32 : i32, i32
  }
  func.func @transform_1(%arg0: i32) -> (i32, i32) {
    %c0_i32 = arith.constant 0 : i32
    %c0_i32_0 = arith.constant 0 : i32
    return %arg0, %c0_i32 : i32, i32
  }
  func.func @transform_2(%arg0: i32) -> (i32, i32) {
    %c0_i32 = arith.constant 0 : i32
    %c0_i32_0 = arith.constant 0 : i32
    %c0_i32_1 = arith.constant 0 : i32
    return %c0_i32, %c0_i32_0 : i32, i32
  }
  func.func @transform_3(%arg0: i32) -> (i32, i32) {
    %c0_i32 = arith.constant 0 : i32
    %c0_i32_0 = arith.constant 0 : i32
    %c0_i32_1 = arith.constant 0 : i32
    return %c0_i32, %c0_i32_0 : i32, i32
  }
  func.func @transform_4(%arg0: i32) -> (i32, i32) {
    %c0_i32 = arith.constant 0 : i32
    %c0_i32_0 = arith.constant 0 : i32
    return %arg0, %c0_i32 : i32, i32
  }
}

</mosaic_0001>

<bundles_post_ra>
// kernel: tpu_custom_call.1
= control target key start
LH: loop header
LB: loop body
LE: loop exit
PB: predicated region body
PF: predicated region fallthrough
CT: control target
= control target key end

     0   :  { %s3164_s15 = smov 0   ;;  %s3497_s0 = inlined_call_operand.vmem [shape: f32[128,16], index: 0, kind: input, shape index: {}]   ;;  %s3498_s1 = inlined_call_operand.vmem [shape: f32[128,16], index: 1, kind: input, shape index: {}]   ;;  %s3499_s2 = inlined_call_operand.vmem [shape: f32[16,16], index: 2, kind: input, shape index: {}]   ;;  %s3500_s3 = inlined_call_operand.vmem [shape: f32[16,16], index: 3, kind: input, shape index: {}]   ;;  %s3501_s4 = inlined_call_operand.vmem [shape: f32[128,1], index: 4, kind: output, shape index: {}]  }
   0x1 LB: > { %s2664_s16 = sadd.s32 4294967295, %s3137_s15   ;;  %p2668_p0 = scmp.ge.s32.totalorder %s3137_s15, 1  ;;  %s3137_s15 = sphi %s3164_s15, %s14_s15  }
   0x2   : > { %p174_p1 = scmp.lt.s32.totalorder %s3137_s15, 3 }
   0x4   : > { %p175_p2 = pnand %p2668_p0, %p174_p1 }
   0x5   : > { %s2669_s21 = sshll.u32 (!%p175_p2), %s2664_s16, 3 }
   0x6   : > { %178 = sbr.rel (%p175_p2) target bundleno = 643 (0x283), region = 36  ;;  %p206_p3 = scmp.lt.s32.totalorder (!%p175_p2), %s2669_s21, 15 }
   0xb   : > { %v3175_v0 = vld [vmem:[%s3499_s2 + $0x8] sm:$0xff]  ;;  %v3180_v1 = vld [vmem:[%s3499_s2] sm:$0xff]  ;;  %s3503_s21 = smov (!%p206_p3, %s2669_s21), 15  ;;  %vm243_vm0 = vcmask 130048   ;;  %vm1336_vm1 = vcmask 7168  }
   0xc   : > { %2887 = vmatprep.subr.mxu0 %v3175_v0  ;;  %2903 = vmatprep.subr.mxu1 %v3175_v0  ;;  %s3190_s22 = sshll.u32 %s3503_s21, 3  ;;  %v3335_v42 = vld [vmem:[%s3500_s3] sm:$0xff]  ;;  %v3344_v46 = vld [vmem:[%s3500_s3 + $0x8] sm:$0xff] }
   0xd   : > { %2888 = vmatpush3.msra.mxu0 %v3175_v0  ;;  %2904 = vmatpush3.msra.mxu1 %v3175_v0  ;;  %s3198_s25 = scalar_lea.vmem %s3497_s0, %s3190_s22  ;;  %s3204_s28 = scalar_lea.vmem %s3498_s1, %s3190_s22 }
   0xe   : > { %2889 = vmatprep.subr.mxu0 %v3180_v1  ;;  %2905 = vmatprep.subr.mxu1 %v3180_v1  ;;  %v3207_v2 = vld [vmem:[%s3198_s25] sm:$0xff]  ;;  %v3210_v3 = vld [vmem:[%s3198_s25 + $0x8] sm:$0xff]  ;;  %v3213_v4 = vld [vmem:[%s3198_s25 + $0x10] sm:$0xff]  ;;  %s221_s9 = scalar_lea.vmem %s3501_s4, %s3190_s22 }
   0xf   : > { %2890 = vmatpush3.msra.mxu0 %v3180_v1  ;;  %2906 = vmatpush3.msra.mxu1 %v3180_v1  ;;  %v3218_v5 = vld [vmem:[%s3204_s28] sm:$0xff]  ;;  %v3221_v6 = vld [vmem:[%s3204_s28 + $0x8] sm:$0xff]  ;;  %v3228_v7 = vld [vmem:[%s3204_s28 + $0x10] sm:$0xff]  ;;  %v502_v16 = vmul.f32 %v3207_v2, %v3207_v2  ;;  %v503_v20 = vmul.f32 %v3210_v3, %v3210_v3  ;;  %v504_v21 = vmul.f32 %v3213_v4, %v3213_v4 }
  0x10   : > { %2919 = vmatprep.subr.mxu0 %v3175_v0  ;;  %2935 = vmatprep.subr.mxu1 %v3175_v0  ;;  %v3233_v8 = vld [vmem:[%s3198_s25 + $0x18] sm:$0xff]  ;;  %v3238_v9 = vld [vmem:[%s3198_s25 + $0x20] sm:$0xff]  ;;  %v228_v12 = vld [vmem:[%s3198_s25 + $0x28] sm:$0xff]  ;;  %v639_v18 = vmul.f32 %v3218_v5, %v3218_v5  ;;  %v640_v22 = vmul.f32 %v3221_v6, %v3221_v6  ;;  %v641_v23 = vmul.f32 %v3228_v7, %v3228_v7 }
  0x11   : > { %2891 = vmatprep.mubr.msk.f32.mxu0 %vm243_vm0, %v3207_v2  ;;  %2907 = vmatprep.mubr.msk.f32.mxu1 %vm243_vm0, %v3218_v5  ;;  %v3243_v10 = vld [vmem:[%s3204_s28 + $0x18] sm:$0xff]  ;;  %v3246_v11 = vld [vmem:[%s3204_s28 + $0x20] sm:$0xff]  ;;  %v229_v13 = vld [vmem:[%s3198_s25 + $0x30] sm:$0xff]  ;;  %v505_v24 = vmul.f32 %v3233_v8, %v3233_v8  ;;  %v506_v25 = vmul.f32 %v3238_v9, %v3238_v9  ;;  %v507_v28 = vmul.f32 %v228_v12, %v228_v12 }
  0x12   : > { %2892 = vmatmul.mubr.msk.f32.vlgmr.msra.gmra.mxu0 %vm243_vm0, %v3210_v3  ;;  %2908 = vmatmul.mubr.msk.f32.vlgmr.msra.gmra.mxu1 %vm243_vm0, %v3221_v6  ;;  %v236_v14 = vld [vmem:[%s3204_s28 + $0x28] sm:$0xff]  ;;  %v237_v15 = vld [vmem:[%s3204_s28 + $0x30] sm:$0xff]  ;;  %v230_v17 = vld [vmem:[%s3198_s25 + $0x38] sm:$0xff]  ;;  %v642_v26 = vmul.f32 %v3243_v10, %v3243_v10  ;;  %v643_v27 = vmul.f32 %v3246_v11, %v3246_v11  ;;  %v508_v29 = vmul.f32 %v229_v13, %v229_v13 }
  0x13   : > { %2894 = vmatprep.mubr.msk.f32.mxu0 %vm243_vm0, %v3213_v4  ;;  %2910 = vmatprep.mubr.msk.f32.mxu1 %vm243_vm0, %v3228_v7  ;;  %v238_v19 = vld [vmem:[%s3204_s28 + $0x38] sm:$0xff]  ;;  %v644_v30 = vmul.f32 %v236_v14, %v236_v14  ;;  %v645_v31 = vmul.f32 %v237_v15, %v237_v15  ;;  %v509_v32 = vmul.f32 %v230_v17, %v230_v17 }
  0x14   : > { %2920 = vmatpush3.msra.mxu0 %v3175_v0  ;;  %2936 = vmatpush3.msra.mxu1 %v3175_v0  ;;  %v776_v33 = vmul.f32 %v3218_v5, %v3207_v2  ;;  %v646_v34 = vmul.f32 %v238_v19, %v238_v19  ;;  %v777_v35 = vmul.f32 %v3221_v6, %v3210_v3 }
  0x15   : > { %2921 = vmatprep.subr.mxu0 %v3180_v1  ;;  %2937 = vmatprep.subr.mxu1 %v3180_v1  ;;  %v778_v36 = vmul.f32 %v3228_v7, %v3213_v4  ;;  %v779_v37 = vmul.f32 %v3243_v10, %v3233_v8  ;;  %v780_v38 = vmul.f32 %v3246_v11, %v3238_v9 }
  0x16   : > { %2895 = vmatmul.mubr.msk.f32.gmra.mxu0 %vm243_vm0, %v3233_v8  ;;  %2911 = vmatmul.mubr.msk.f32.gmra.mxu1 %vm243_vm0, %v3243_v10  ;;  %v781_v39 = vmul.f32 %v236_v14, %v228_v12  ;;  %v782_v40 = vmul.f32 %v237_v15, %v229_v13  ;;  %v783_v41 = vmul.f32 %v238_v19, %v230_v17 }
  0x17   : > { %2897 = vmatprep.mubr.msk.f32.mxu0 %vm243_vm0, %v3238_v9  ;;  %2913 = vmatprep.mubr.msk.f32.mxu1 %vm243_vm0, %v3246_v11 }
  0x18   : > { %2922 = vmatpush3.msra.mxu0 %v3180_v1  ;;  %2938 = vmatpush3.msra.mxu1 %v3180_v1 }
  0x19   : > { %2951 = vmatprep.subr.mxu0 %v3175_v0 }
  0x1a   : > { %2898 = vmatmul.mubr.msk.f32.gmra.mxu0 %vm243_vm0, %v228_v12  ;;  %2914 = vmatmul.mubr.msk.f32.gmra.mxu1 %vm243_vm0, %v236_v14 }
  0x1b   : > { %2900 = vmatprep.mubr.msk.f32.mxu0 %vm243_vm0, %v229_v13  ;;  %2916 = vmatprep.mubr.msk.f32.mxu1 %vm243_vm0, %v237_v15 }
  0x1e   : > { %2901 = vmatmul.mubr.msk.f32.gmra.mxu0 %vm243_vm0, %v230_v17  ;;  %2917 = vmatmul.mubr.msk.f32.gmra.mxu1 %vm243_vm0, %v238_v19 }
  0x1f   : > { %2923 = vmatprep.mubr.msk.f32.mxu0 %vm243_vm0, %v502_v16  ;;  %2939 = vmatprep.mubr.msk.f32.mxu1 %vm243_vm0, %v639_v18 }
  0x22   : > { %2924 = vmatmul.mubr.msk.f32.vlgmr.msra.gmra.mxu0 %vm243_vm0, %v503_v20  ;;  %2940 = vmatmul.mubr.msk.f32.vlgmr.msra.gmra.mxu1 %vm243_vm0, %v640_v22 }
  0x23   : > { %2926 = vmatprep.mubr.msk.f32.mxu0 %vm243_vm0, %v504_v21  ;;  %2952 = vmatpush3.msra.mxu0 %v3175_v0 }
  0x24   : > { %2942 = vmatprep.mubr.msk.f32.mxu1 %vm243_vm0, %v641_v23  ;;  %2953 = vmatprep.subr.mxu0 %v3180_v1 }
  0x25   : > { %2954 = vmatpush3.msra.mxu0 %v3180_v1 }
  0x26   : > { %2927 = vmatmul.mubr.msk.f32.gmra.mxu0 %vm243_vm0, %v505_v24  ;;  %2943 = vmatmul.mubr.msk.f32.gmra.mxu1 %vm243_vm0, %v642_v26 }
  0x27   : > { %2929 = vmatprep.mubr.msk.f32.mxu0 %vm243_vm0, %v506_v25  ;;  %2945 = vmatprep.mubr.msk.f32.mxu1 %vm243_vm0, %v643_v27 }
  0x2a   : > { %2930 = vmatmul.mubr.msk.f32.gmra.mxu0 %vm243_vm0, %v507_v28  ;;  %2946 = vmatmul.mubr.msk.f32.gmra.mxu1 %vm243_vm0, %v644_v30 }
  0x2b   : > { %2932 = vmatprep.mubr.msk.f32.mxu0 %vm243_vm0, %v508_v29  ;;  %2948 = vmatprep.mubr.msk.f32.mxu1 %vm243_vm0, %v645_v31 }
  0x2e   : > { %2933 = vmatmul.mubr.msk.f32.gmra.mxu0 %vm243_vm0, %v509_v32  ;;  %2949 = vmatmul.mubr.msk.f32.gmra.mxu1 %vm243_vm0, %v646_v34 }
  0x2f   : > { %2955 = vmatprep.mubr.msk.f32.mxu0 %vm243_vm0, %v776_v33  ;;  %2971 = vmatprep.mubr.msk.f32.mxu1 %vm243_vm0, %v3335_v42 }
  0x32   : > { %2956 = vmatmul.mubr.msk.f32.vlgmr.msra.gmra.mxu0 %vm243_vm0, %v777_v35 }
  0x33   : > { %2958 = vmatprep.mubr.msk.f32.mxu0 %vm243_vm0, %v778_v36 }
  0x36   : > { %2959 = vmatmul.mubr.msk.f32.gmra.mxu0 %vm243_vm0, %v779_v37 }
  0x37   : > { %2961 = vmatprep.mubr.msk.f32.mxu0 %vm243_vm0, %v780_v38 }
  0x3a   : > { %2962 = vmatmul.mubr.msk.f32.gmra.mxu0 %vm243_vm0, %v781_v39 }
  0x3b   : > { %2964 = vmatprep.mubr.msk.f32.mxu0 %vm243_vm0, %v782_v40 }
  0x3e   : > { %2965 = vmatmul.mubr.msk.f32.gmra.mxu0 %vm243_vm0, %v783_v41 }
  0x3f   : > { %2999 = vmatprep.mubr.msk.f32.mxu0 %vm243_vm0, %v3335_v42 }
  0xd2   : > { %v2893_v43 = vpop.f32.mrf.mxu0  ;;  %v2909_v44 = vpop.f32.mrf.mxu1 }
  0xd3   : > { %2967 = vmatprep.subr.mxu1 %v2893_v43 }
  0xd4   : > { %v334_v45 = vpop.f32.mrf.mxu0  ;;  %2968 = vmatpush3.msra.mxu1 %v2893_v43  ;;  %v463_v47 = vpop.f32.mrf.mxu1 }
  0xd5   : > { %2969 = vmatprep.subr.mxu1 %v334_v45 }
  0xd6   : > { %v2896_v48 = vpop.f32.mrf.mxu0  ;;  %2970 = vmatpush3.msra.mxu1 %v334_v45  ;;  %v3346_v49 = vpop.f32.mrf.mxu1 }
  0xd7   : > { %2972 = vmatmul.mubr.msk.f32.vlgmr.msra.gmra.mxu1 %vm243_vm0, %v3344_v46  ;;  %2974 = vmatprep.subr.mxu1 %v2909_v44 }
  0xd8   : > { %v344_v50 = vpop.f32.mrf.mxu0  ;;  %2975 = vmatpush3.msra.mxu1 %v2909_v44  ;;  %2978 = vmatprep.mubr.msk.f32.mxu1 %vm243_vm0, %v3335_v42  ;;  %v473_v51 = vpop.f32.mrf.mxu1 }
  0xd9   : > { %2976 = vmatprep.subr.mxu1 %v463_v47 }
  0xda   : > { %v3352_v52 = vpop.f32.mrf.mxu0  ;;  %2977 = vmatpush3.msra.mxu1 %v463_v47  ;;  %v3354_v53 = vpop.f32.mrf.mxu1 }
  0xdb   : > { %2979 = vmatmul.mubr.msk.f32.vlgmr.msra.gmra.mxu1 %vm243_vm0, %v3344_v46 }
  0xdc   : > { %v3358_v54 = vpop.f32.mrf.mxu0  ;;  %2985 = vmatprep.mubr.msk.f32.mxu1 %vm243_vm0, %v3335_v42  ;;  %v3362_v55 = vpop.f32.mrf.mxu1 }
  0xde   : > { %v3364_v56 = vpop.f32.mrf.mxu0  ;;  %v3366_v57 = vpop.f32.mrf.mxu1 }
  0xe0   : > { %v3368_v58 = vpop.f32.mrf.mxu0  ;;  %v3370_v59 = vpop.f32.mrf.mxu1 }
  0xe2   : > { %v2925_v60 = vpop.f32.mrf.mxu0  ;;  %v2941_v61 = vpop.f32.mrf.mxu1 }
  0xe3   : > { %2981 = vmatprep.subr.mxu1 %v2925_v60 }
  0xe4   : > { %v600_v62 = vpop.f32.mrf.mxu0  ;;  %2982 = vmatpush3.msra.mxu1 %v2925_v60  ;;  %v737_v0 = vpop.f32.mrf.mxu1 }
  0xe5   : > { %2983 = vmatprep.subr.mxu1 %v600_v62 }
  0xe6   : > { %v2928_v63 = vpop.f32.mrf.mxu0  ;;  %2984 = vmatpush3.msra.mxu1 %v600_v62  ;;  %v2944_v10 = vpop.f32.mrf.mxu1 }
  0xe7   : > { %2986 = vmatmul.mubr.msk.f32.vlgmr.msra.gmra.mxu1 %vm243_vm0, %v3344_v46  ;;  %2988 = vmatprep.subr.mxu1 %v2941_v61 }
  0xe8   : > { %v610_v1 = vpop.f32.mrf.mxu0  ;;  %2989 = vmatpush3.msra.mxu1 %v2941_v61  ;;  %2992 = vmatprep.mubr.msk.f32.mxu1 %vm243_vm0, %v3335_v42  ;;  %v747_v11 = vpop.f32.mrf.mxu1 }
  0xe9   : > { %2990 = vmatprep.subr.mxu1 %v737_v0 }
  0xea   : > { %v3376_v2 = vpop.f32.mrf.mxu0  ;;  %2991 = vmatpush3.msra.mxu1 %v737_v0  ;;  %v2947_v12 = vpop.f32.mrf.mxu1 }
  0xeb   : > { %2993 = vmatmul.mubr.msk.f32.vlgmr.msra.gmra.mxu1 %vm243_vm0, %v3344_v46  ;;  %3002 = vmatprep.subr.mxu1 %v2896_v48 }
  0xec   : > { %v3380_v3 = vpop.f32.mrf.mxu0  ;;  %3003 = vmatpush3.msra.mxu1 %v2896_v48  ;;  %3006 = vmatprep.mubr.msk.f32.mxu1 %vm243_vm0, %v3335_v42  ;;  %v757_v13 = vpop.f32.mrf.mxu1 }
  0xed   : > { %3004 = vmatprep.subr.mxu1 %v344_v50 }
  0xee   : > { %v3384_v4 = vpop.f32.mrf.mxu0  ;;  %3005 = vmatpush3.msra.mxu1 %v344_v50  ;;  %v2950_v17 = vpop.f32.mrf.mxu1 }
  0xef   : > { %3016 = vmatprep.subr.mxu1 %v2928_v63  ;;  %3007 = vmatmul.mubr.msk.f32.vlgmr.msra.gmra.mxu1 %vm243_vm0, %v3344_v46 }
  0xf0   : > { %v3388_v5 = vpop.f32.mrf.mxu0  ;;  %3017 = vmatpush3.msra.mxu1 %v2928_v63  ;;  %3020 = vmatprep.mubr.msk.f32.mxu1 %vm243_vm0, %v3335_v42  ;;  %v767_v19 = vpop.f32.mrf.mxu1 }
  0xf1   : > { %3018 = vmatprep.subr.mxu1 %v610_v1 }
  0xf2   : > { %v2957_v6 = vpop.f32.mrf.mxu0  ;;  %3019 = vmatpush3.msra.mxu1 %v610_v1 }
  0xf3   : > { %2995 = vmatprep.subr.mxu0 %v2957_v6  ;;  %3021 = vmatmul.mubr.msk.f32.vlgmr.msra.gmra.mxu1 %vm243_vm0, %v3344_v46 }
  0xf4   : > { %v874_v7 = vpop.f32.mrf.mxu0  ;;  %2996 = vmatpush3.msra.mxu0 %v2957_v6  ;;  %3034 = vmatprep.mubr.msk.f32.mxu1 %vm243_vm0, %v3335_v42 }
  0xf5   : > { %2997 = vmatprep.subr.mxu0 %v874_v7 }
  0xf6   : > { %v2960_v8 = vpop.f32.mrf.mxu0  ;;  %2998 = vmatpush3.msra.mxu0 %v874_v7 }
  0xf7   : > { %3000 = vmatmul.mubr.msk.f32.vlgmr.msra.gmra.mxu0 %vm243_vm0, %v3344_v46  ;;  %3009 = vmatprep.subr.mxu0 %v3346_v49 }
  0xf8   : > { %3030 = vmatprep.subr.mxu1 %v2960_v8  ;;  %v884_v9 = vpop.f32.mrf.mxu0  ;;  %3010 = vmatpush3.msra.mxu0 %v3346_v49 }
  0xf9   : > { %3031 = vmatpush3.msra.mxu1 %v2960_v8  ;;  %3011 = vmatprep.subr.mxu0 %v473_v51 }
  0xfa   : > { %3032 = vmatprep.subr.mxu1 %v884_v9  ;;  %3012 = vmatpush3.msra.mxu0 %v473_v51  ;;  %v2963_v14 = vpop.f32.mrf.mxu0 }
  0xfb   : > { %3013 = vmatprep.mubr.msk.f32.mxu0 %vm243_vm0, %v3335_v42  ;;  %3033 = vmatpush3.msra.mxu1 %v884_v9 }
  0xfc   : > { %3014 = vmatmul.mubr.msk.f32.vlgmr.msra.gmra.mxu0 %vm243_vm0, %v3344_v46  ;;  %3023 = vmatprep.subr.mxu0 %v2944_v10  ;;  %v894_v15 = vpop.f32.mrf.mxu0 }
  0xfd   : > { %3044 = vmatprep.subr.mxu1 %v3354_v53  ;;  %3024 = vmatpush3.msra.mxu0 %v2944_v10 }
  0xfe   : > { %3035 = vmatmul.mubr.msk.f32.vlgmr.msra.gmra.mxu1 %vm243_vm0, %v3344_v46  ;;  %3025 = vmatprep.subr.mxu0 %v747_v11  ;;  %v2966_v16 = vpop.f32.mrf.mxu0 }
  0xff   : > { %3045 = vmatpush3.msra.mxu1 %v3354_v53  ;;  %3026 = vmatpush3.msra.mxu0 %v747_v11 }
 0x100   : > { %3046 = vmatprep.subr.mxu1 %v3362_v55  ;;  %3027 = vmatprep.mubr.msk.f32.mxu0 %vm243_vm0, %v3335_v42  ;;  %v904_v18 = vpop.f32.mrf.mxu0 }
 0x101   : > { %3047 = vmatpush3.msra.mxu1 %v3362_v55  ;;  %3028 = vmatmul.mubr.msk.f32.vlgmr.msra.gmra.mxu0 %vm243_vm0, %v3344_v46 }
 0x102   : > { %3037 = vmatprep.subr.mxu0 %v3352_v52  ;;  %3048 = vmatprep.mubr.msk.f32.mxu1 %vm243_vm0, %v3335_v42 }
 0x103   : > { %3058 = vmatprep.subr.mxu1 %v2947_v12  ;;  %3038 = vmatpush3.msra.mxu0 %v3352_v52 }
 0x104   : > { %3049 = vmatmul.mubr.msk.f32.vlgmr.msra.gmra.mxu1 %vm243_vm0, %v3344_v46  ;;  %3039 = vmatprep.subr.mxu0 %v3358_v54 }
 0x105   : > { %3059 = vmatpush3.msra.mxu1 %v2947_v12  ;;  %3040 = vmatpush3.msra.mxu0 %v3358_v54 }
 0x106   : > { %3060 = vmatprep.subr.mxu1 %v757_v13  ;;  %3041 = vmatprep.mubr.msk.f32.mxu0 %vm243_vm0, %v3335_v42 }
 0x107   : > { %3061 = vmatpush3.msra.mxu1 %v757_v13  ;;  %3042 = vmatmul.mubr.msk.f32.vlgmr.msra.gmra.mxu0 %vm243_vm0, %v3344_v46 }
 0x108   : > { %3051 = vmatprep.subr.mxu0 %v3376_v2  ;;  %3062 = vmatprep.mubr.msk.f32.mxu1 %vm243_vm0, %v3335_v42 }
 0x109   : > { %3072 = vmatprep.subr.mxu1 %v3364_v56  ;;  %3052 = vmatpush3.msra.mxu0 %v3376_v2 }
 0x10a   : > { %3063 = vmatmul.mubr.msk.f32.vlgmr.msra.gmra.mxu1 %vm243_vm0, %v3344_v46  ;;  %3053 = vmatprep.subr.mxu0 %v3380_v3 }
 0x10b   : > { %3073 = vmatpush3.msra.mxu1 %v3364_v56  ;;  %3054 = vmatpush3.msra.mxu0 %v3380_v3 }
 0x10c   : > { %3074 = vmatprep.subr.mxu1 %v3368_v58  ;;  %3055 = vmatprep.mubr.msk.f32.mxu0 %vm243_vm0, %v3335_v42 }
 0x10d   : > { %3075 = vmatpush3.msra.mxu1 %v3368_v58  ;;  %3056 = vmatmul.mubr.msk.f32.vlgmr.msra.gmra.mxu0 %vm243_vm0, %v3344_v46 }
 0x10e   : > { %3065 = vmatprep.subr.mxu0 %v2963_v14  ;;  %3076 = vmatprep.mubr.msk.f32.mxu1 %vm243_vm0, %v3335_v42 }
 0x10f   : > { %3086 = vmatprep.subr.mxu1 %v3384_v4  ;;  %3066 = vmatpush3.msra.mxu0 %v2963_v14 }
 0x110   : > { %3077 = vmatmul.mubr.msk.f32.vlgmr.msra.gmra.mxu1 %vm243_vm0, %v3344_v46  ;;  %3067 = vmatprep.subr.mxu0 %v894_v15 }
 0x111   : > { %3087 = vmatpush3.msra.mxu1 %v3384_v4  ;;  %3068 = vmatpush3.msra.mxu0 %v894_v15 }
 0x112   : > { %3088 = vmatprep.subr.mxu1 %v3388_v5  ;;  %3069 = vmatprep.mubr.msk.f32.mxu0 %vm243_vm0, %v3335_v42 }
 0x113   : > { %3089 = vmatpush3.msra.mxu1 %v3388_v5  ;;  %3070 = vmatmul.mubr.msk.f32.vlgmr.msra.gmra.mxu0 %vm243_vm0, %v3344_v46 }
 0x114   : > { %3079 = vmatprep.subr.mxu0 %v3366_v57  ;;  %3083 = vmatprep.mubr.msk.f32.mxu0 %vm243_vm0, %v3335_v42 }
 0x115   : > { %3080 = vmatpush3.msra.mxu0 %v3366_v57  ;;  %3090 = vmatprep.mubr.msk.f32.mxu1 %vm243_vm0, %v3335_v42 }
 0x116   : > { %3081 = vmatprep.subr.mxu0 %v3370_v59  ;;  %3091 = vmatmul.mubr.msk.f32.vlgmr.msra.gmra.mxu1 %vm243_vm0, %v3344_v46 }
 0x117   : > { %3082 = vmatpush3.msra.mxu0 %v3370_v59  ;;  %3100 = vmatprep.subr.mxu1 %v2966_v16 }
 0x118   : > { %3084 = vmatmul.mubr.msk.f32.vlgmr.msra.gmra.mxu0 %vm243_vm0, %v3344_v46  ;;  %3093 = vmatprep.subr.mxu0 %v2950_v17 }
 0x119   : > { %3094 = vmatpush3.msra.mxu0 %v2950_v17  ;;  %3097 = vmatprep.mubr.msk.f32.mxu0 %vm243_vm0, %v3335_v42 }
 0x11a   : > { %3095 = vmatprep.subr.mxu0 %v767_v19  ;;  %3101 = vmatpush3.msra.mxu1 %v2966_v16 }
 0x11b   : > { %3096 = vmatpush3.msra.mxu0 %v767_v19  ;;  %3102 = vmatprep.subr.mxu1 %v904_v18 }
 0x11c   : > { %3098 = vmatmul.mubr.msk.f32.vlgmr.msra.gmra.mxu0 %vm243_vm0, %v3344_v46  ;;  %3103 = vmatpush3.msra.mxu1 %v904_v18 }
 0x11d   : > { %3104 = vmatprep.mubr.msk.f32.mxu1 %vm243_vm0, %v3335_v42 }
 0x11e   : > { %3105 = vmatmul.mubr.msk.f32.vlgmr.msra.gmra.mxu1 %vm243_vm0, %v3344_v46 }
 0x197   : > { %v2973_v20 = vpop.f32.mrf.mxu1 }
 0x198   : > { %v1295_v24 = vmul.f32 %v2973_v20, %v2973_v20 }
 0x199   : > { %v985_v21 = vpop.f32.mrf.mxu1 }
 0x19a   : > { %v1294_v26 = vmul.f32 %v985_v21, %v985_v21 }
 0x19b   : > { %v2980_v22 = vpop.f32.mrf.mxu1 }
 0x19c   : > { %v1297_v27 = vmul.f32 %v2980_v22, %v2980_v22  ;;  %v1299_v48 = vmul.f32 %v2980_v22, %v2973_v20 }
 0x19d   : > { %v1060_v23 = vpop.f32.mrf.mxu1 }
 0x19e   : > { %v1317_v29 = vadd.f32 %v1297_v27, %v1295_v24  ;;  %v1296_v30 = vmul.f32 %v1060_v23, %v1060_v23  ;;  %v1298_v51 = vmul.f32 %v1060_v23, %v985_v21  ;;  %v1307_v54 = vmul.f32 2.0, %v1299_v48 }
 0x1a0   : > { %v1319_v36 = vadd.f32 0.0001, %v1317_v29  ;;  %v1316_v37 = vadd.f32 %v1296_v30, %v1294_v26  ;;  %v1306_v61 = vmul.f32 2.0, %v1298_v51  ;;  %v1309_v62 = vadd.f32 0.0001, %v1307_v54 }
 0x1a2   : > { %v1318_v43 = vadd.f32 0.0001, %v1316_v37  ;;  %v1308_v9 = vadd.f32 0.0001, %v1306_v61 }
 0x1a7   : > { %v2987_v25 = vpop.f32.mrf.mxu1 }
 0x1a8   : > { %v1301_v31 = vsub.f32 %v2987_v25, %v1295_v24 }
 0x1a9   : > { %v1135_v28 = vpop.f32.mrf.mxu1 }
 0x1aa   : > { %v1300_v33 = vsub.f32 %v1135_v28, %v1294_v26 }
 0x1ab   : > { %v2994_v32 = vpop.f32.mrf.mxu1 }
 0x1ac   : > { %v1303_v34 = vsub.f32 %v2994_v32, %v1297_v27 }
 0x1ad   : > { %v1210_v35 = vpop.f32.mrf.mxu1 }
 0x1ae   : > { %v1321_v38 = vadd.f32 %v1303_v34, %v1301_v31  ;;  %v1302_v39 = vsub.f32 %v1210_v35, %v1296_v30 }
 0x1af   : > { %v3008_v40 = vpop.f32.mrf.mxu1 }
 0x1b0   : > { %v1323_v41 = vadd.f32 0.0009, %v1321_v38  ;;  %v1320_v42 = vadd.f32 %v1302_v39, %v1300_v33  ;;  %v1715_v63 = vmul.f32 %v3008_v40, %v3008_v40 }
 0x1b1   : > { %v1405_v46 = vpop.f32.mrf.mxu1 }
 0x1b2   : > { %v1325_v44 = vmul.f32 %v1323_v41, %v1319_v36  ;;  %v1322_v45 = vadd.f32 0.0009, %v1320_v42  ;;  %v1714_v5 = vmul.f32 %v1405_v46, %v1405_v46 }
 0x1b3   : > { %v3022_v49 = vpop.f32.mrf.mxu1 }
 0x1b4   : > { %3115 = vrcp.f32 %v1325_v44  ;;  %v1324_v47 = vmul.f32 %v1322_v45, %v1318_v43  ;;  %v1721_v12 = vsub.f32 %v3022_v49, %v1715_v63 }
 0x1b5   : > { %v1555_v57 = vpop.f32.mrf.mxu1 }
 0x1b6   : > { %3117 = vrcp.f32 %v1324_v47  ;;  %v1720_v19 = vsub.f32 %v1555_v57, %v1714_v5 }
 0x1b7   : > { %v3001_v50 = vpop.f32.mrf.mxu0 }
 0x1b8   : > { %v1305_v52 = vsub.f32 %v3001_v50, %v1299_v48 }
 0x1b9   : > { %v1285_v53 = vpop.f32.mrf.mxu0 }
 0x1ba   : > { %v1311_v55 = vmul.f32 2.0, %v1305_v52  ;;  %v1304_v56 = vsub.f32 %v1285_v53, %v1298_v51 }
 0x1bc   : > { %v1313_v58 = vadd.f32 0.0009, %v1311_v55  ;;  %v1310_v59 = vmul.f32 2.0, %v1304_v56  ;;  %v3015_v60 = vpop.f32.mrf.mxu0 }
 0x1bd   : > { %v1717_v0 = vmul.f32 %v3015_v60, %v3015_v60  ;;  %v1719_v23 = vmul.f32 %v3015_v60, %v3008_v40 }
 0x1be   : > { %v1480_v1 = vpop.f32.mrf.mxu0  ;;  %v3036_v2 = vpop.f32.mrf.mxu1  ;;  %v1312_v3 = vadd.f32 0.0009, %v1310_v59  ;;  %v1315_v4 = vmul.f32 %v1313_v58, %v1309_v62 }
 0x1bf   : > { %v1716_v6 = vmul.f32 %v1480_v1, %v1480_v1  ;;  %v1737_v11 = vadd.f32 %v1717_v0, %v1715_v63  ;;  %v1718_v30 = vmul.f32 %v1480_v1, %v1405_v46  ;;  %v1725_v35 = vsub.f32 %v3036_v2, %v1719_v23 }
 0x1c0   : > { %v1705_v7 = vpop.f32.mrf.mxu1  ;;  %v1314_v16 = vmul.f32 %v1312_v3, %v1308_v9  ;;  %v1727_v52 = vmul.f32 2.0, %v1719_v23 }
 0x1c1   : > { %v3116_v8 = vpop.eup %3115  ;;  %v3029_v10 = vpop.f32.mrf.mxu0  ;;  %v1736_v18 = vadd.f32 %v1716_v6, %v1714_v5  ;;  %v1739_v26 = vadd.f32 0.0001, %v1737_v11  ;;  %v1724_v42 = vsub.f32 %v1705_v7, %v1718_v30  ;;  %v1731_v47 = vmul.f32 2.0, %v1725_v35 }
 0x1c2   : > { %v1723_v13 = vsub.f32 %v3029_v10, %v1717_v0  ;;  %v1329_v14 = vmul.f32 %v3116_v8, %v1315_v4  ;;  %v1726_v59 = vmul.f32 2.0, %v1718_v30  ;;  %v1729_v0 = vadd.f32 0.0001, %v1727_v52 }
 0x1c3   : > { %v3118_v15 = vpop.eup %3117  ;;  %v1630_v17 = vpop.f32.mrf.mxu0  ;;  %v1738_v32 = vadd.f32 0.0001, %v1736_v18  ;;  %v1730_v53 = vmul.f32 2.0, %v1724_v42  ;;  %v1733_v60 = vadd.f32 0.0009, %v1731_v47 }
 0x1c4   : > { %v1741_v20 = vadd.f32 %v1723_v13, %v1721_v12  ;;  %v1722_v21 = vsub.f32 %v1630_v17, %v1716_v6  ;;  %v3050_v22 = vpop.f32.mrf.mxu1  ;;  %v1333_v24 = vsel %vm243_vm0, %v1329_v14, 0.0  ;;  %v1327_v25 = vmul.f32 %v3118_v15, %v1314_v16 }
 0x1c5   : > { %1334 = vadd.xlane.f32.xlu0 %v1333_v24  ;;  %v2136_v40 = vmul.f32 %v3050_v22, %v3050_v22  ;;  %v1732_v1 = vadd.f32 0.0009, %v1730_v53  ;;  %v1728_v8 = vadd.f32 0.0001, %v1726_v59  ;;  %v1735_v9 = vmul.f32 %v1733_v60, %v1729_v0 }
 0x1c6   : > { %v1743_v27 = vadd.f32 0.0009, %v1741_v20  ;;  %v1740_v28 = vadd.f32 %v1722_v21, %v1720_v19  ;;  %v1899_v29 = vpop.f32.mrf.mxu1  ;;  %v1330_v37 = vsel %vm243_vm0, %v1327_v25, 0.0 }
 0x1c7   : > { %v3043_v31 = vpop.f32.mrf.mxu0  ;;  %v2135_v43 = vmul.f32 %v1899_v29, %v1899_v29  ;;  %v1734_v15 = vmul.f32 %v1732_v1, %v1728_v8 }
 0x1c8   : > { %v1745_v33 = vmul.f32 %v1743_v27, %v1739_v26  ;;  %v1742_v34 = vadd.f32 0.0009, %v1740_v28  ;;  %v2134_v39 = vmul.f32 %v3043_v31, %v3043_v31  ;;  %v2138_v3 = vmul.f32 %v3050_v22, %v3043_v31 }
 0x1c9   : > { %v1824_v36 = vpop.f32.mrf.mxu0  ;;  %1331 = vadd.xlane.f32.xlu0 %v1330_v37 }
 0x1ca   : > { %3119 = vrcp.f32 %v1745_v33  ;;  %v1744_v38 = vmul.f32 %v1742_v34, %v1738_v32  ;;  %v3064_v41 = vpop.f32.mrf.mxu1  ;;  %v2133_v44 = vmul.f32 %v1824_v36, %v1824_v36  ;;  %v2156_v49 = vadd.f32 %v2136_v40, %v2134_v39 }
 0x1cb   : > { %v2142_v45 = vsub.f32 %v3064_v41, %v2136_v40  ;;  %v2137_v11 = vmul.f32 %v1899_v29, %v1824_v36  ;;  %v2146_v29 = vmul.f32 2.0, %v2138_v3 }
 0x1cc   : > { %3121 = vrcp.f32 %v1744_v38  ;;  %v2049_v46 = vpop.f32.mrf.mxu1  ;;  %v2155_v55 = vadd.f32 %v2135_v43, %v2133_v44  ;;  %v2158_v61 = vadd.f32 0.0001, %v2156_v49 }
 0x1cd   : > { %v3057_v48 = vpop.f32.mrf.mxu0  ;;  %v2141_v51 = vsub.f32 %v2049_v46, %v2135_v43  ;;  %v2145_v33 = vmul.f32 2.0, %v2137_v11  ;;  %v2148_v43 = vadd.f32 0.0001, %v2146_v29 }
 0x1ce   : > { %v2140_v50 = vsub.f32 %v3057_v48, %v2134_v39  ;;  %v2157_v4 = vadd.f32 0.0001, %v2155_v55 }
 0x1cf   : > { %v1974_v54 = vpop.f32.mrf.mxu0  ;;  %v2147_v47 = vadd.f32 0.0001, %v2145_v33 }
 0x1d0   : > { %v2160_v56 = vadd.f32 %v2142_v45, %v2140_v50  ;;  %v2139_v57 = vsub.f32 %v1974_v54, %v2133_v44  ;;  %v3078_v58 = vpop.f32.mrf.mxu1 }
 0x1d1   : > { %v2553_v21 = vmul.f32 %v3078_v58, %v3078_v58 }
 0x1d2   : > { %v2162_v62 = vadd.f32 0.0009, %v2160_v56  ;;  %v2159_v63 = vadd.f32 %v2141_v51, %v2139_v57  ;;  %v2243_v7 = vpop.f32.mrf.mxu1 }
 0x1d3   : > { %v3071_v2 = vpop.f32.mrf.mxu0  ;;  %v2552_v27 = vmul.f32 %v2243_v7, %v2243_v7 }
 0x1d4   : > { %v2164_v5 = vmul.f32 %v2162_v62, %v2158_v61  ;;  %v2161_v6 = vadd.f32 0.0009, %v2159_v63  ;;  %v2144_v13 = vsub.f32 %v3071_v2, %v2138_v3 }
 0x1d5   : > { %v2124_v10 = vpop.f32.mrf.mxu0 }
 0x1d6   : > { %3123 = vrcp.f32 %v2164_v5  ;;  %v2163_v12 = vmul.f32 %v2161_v6, %v2157_v4  ;;  %v2143_v16 = vsub.f32 %v2124_v10, %v2137_v11  ;;  %v3092_v18 = vpop.f32.mrf.mxu1  ;;  %v2150_v22 = vmul.f32 2.0, %v2144_v13 }
 0x1d7   : > { %v3120_v14 = vpop.eup %3119  ;;  %v2559_v34 = vsub.f32 %v3092_v18, %v2553_v21 }
 0x1d8   : > { %3125 = vrcp.f32 %v2163_v12  ;;  %v3085_v17 = vpop.f32.mrf.mxu0  ;;  %v1749_v19 = vmul.f32 %v3120_v14, %v1735_v9  ;;  %v2149_v30 = vmul.f32 2.0, %v2143_v16  ;;  %v2393_v32 = vpop.f32.mrf.mxu1  ;;  %v2152_v35 = vadd.f32 0.0009, %v2150_v22 }
 0x1d9   : > { %v3122_v20 = vpop.eup %3121  ;;  %v2555_v23 = vmul.f32 %v3085_v17, %v3085_v17  ;;  %v2558_v41 = vsub.f32 %v2393_v32, %v2552_v27  ;;  %v2557_v50 = vmul.f32 %v3085_v17, %v3078_v58 }
 0x1da   : > { %v2318_v24 = vpop.f32.mrf.mxu0  ;;  %v1753_v25 = vsel %vm243_vm0, %v1749_v19, 0.0  ;;  %v1747_v26 = vmul.f32 %v3122_v20, %v1734_v15  ;;  %v2151_v44 = vadd.f32 0.0009, %v2149_v30  ;;  %v2154_v49 = vmul.f32 %v2152_v35, %v2148_v43 }
 0x1db   : > { %v2554_v28 = vmul.f32 %v2318_v24, %v2318_v24  ;;  %1754 = vadd.xlane.f32.xlu1 %v1753_v25  ;;  %v2575_v36 = vadd.f32 %v2555_v23, %v2553_v21  ;;  %v2556_v54 = vmul.f32 %v2318_v24, %v2243_v7  ;;  %v2565_v6 = vmul.f32 2.0, %v2557_v50 }
 0x1dc   : > { %v3099_v31 = vpop.f32.mrf.mxu0  ;;  %v1750_v39 = vsel %vm243_vm0, %v1747_v26, 0.0  ;;  %v2153_v57 = vmul.f32 %v2151_v44, %v2147_v47 }
 0x1dd   : > { %v2561_v37 = vsub.f32 %v3099_v31, %v2555_v23  ;;  %v2574_v40 = vadd.f32 %v2554_v28, %v2552_v27  ;;  %v2577_v51 = vadd.f32 0.0001, %v2575_v36  ;;  %v2564_v7 = vmul.f32 2.0, %v2556_v54 }
 0x1de   : > { %v2468_v38 = vpop.f32.mrf.mxu0  ;;  %v3106_v46 = vpop.f32.mrf.mxu1  ;;  %v2567_v10 = vadd.f32 0.0001, %v2565_v6 }
 0x1df   : > { %v2560_v42 = vsub.f32 %v2468_v38, %v2554_v28  ;;  %1751 = vadd.xlane.f32.xlu1 %v1750_v39  ;;  %v2579_v45 = vadd.f32 %v2561_v37, %v2559_v34  ;;  %v2576_v55 = vadd.f32 0.0001, %v2574_v40  ;;  %v2563_v0 = vsub.f32 %v3106_v46, %v2557_v50 }
 0x1e0   : > { %v2543_v60 = vpop.f32.mrf.mxu1  ;;  %v2566_v11 = vadd.f32 0.0001, %v2564_v7 }
 0x1e1   : > { %v2578_v48 = vadd.f32 %v2560_v42, %v2558_v41  ;;  %v2581_v52 = vadd.f32 0.0009, %v2579_v45  ;;  %v2562_v3 = vsub.f32 %v2543_v60, %v2556_v54  ;;  %v2569_v4 = vmul.f32 2.0, %v2563_v0 }
 0x1e3   : > { %v3124_v53 = vpop.eup %3123  ;;  %v2580_v56 = vadd.f32 0.0009, %v2578_v48  ;;  %v2583_v59 = vmul.f32 %v2581_v52, %v2577_v51  ;;  %v2568_v5 = vmul.f32 2.0, %v2562_v3  ;;  %v2571_v8 = vadd.f32 0.0009, %v2569_v4 }
 0x1e4   : > { %v2168_v61 = vmul.f32 %v3124_v53, %v2154_v49 }
 0x1e5   : > { %v3126_v62 = vpop.eup %3125  ;;  %v2582_v63 = vmul.f32 %v2580_v56, %v2576_v55  ;;  %3127 = vrcp.f32 %v2583_v59  ;;  %v2570_v9 = vadd.f32 0.0009, %v2568_v5  ;;  %v2573_v12 = vmul.f32 %v2571_v8, %v2567_v10 }
 0x1e6   : > { %v2172_v1 = vsel %vm243_vm0, %v2168_v61, 0.0  ;;  %v2166_v2 = vmul.f32 %v3126_v62, %v2153_v57 }
 0x1e7   : > { %3129 = vrcp.f32 %v2582_v63  ;;  %2173 = vadd.xlane.f32.xlu1 %v2172_v1  ;;  %v2572_v14 = vmul.f32 %v2570_v9, %v2566_v11 }
 0x1e8   : > { %v2169_v58 = vsel %vm243_vm0, %v2166_v2, 0.0 }
 0x1e9   : > { %2170 = vadd.xlane.f32.xlu0 %v2169_v58 }
 0x1f2   : > { %v3128_v13 = vpop.eup %3127 }
 0x1f3   : > { %v2587_v16 = vmul.f32 %v3128_v13, %v2573_v12 }
 0x1f4   : > { %v3130_v15 = vpop.eup %3129 }
 0x1f5   : > { %v2585_v17 = vmul.f32 %v3130_v15, %v2572_v14  ;;  %v2591_v18 = vsel %vm243_vm0, %v2587_v16, 0.0 }
 0x1f6   : > { %2592 = vadd.xlane.f32.xlu1 %v2591_v18 }
 0x1f7   : > { %v2588_v19 = vsel %vm243_vm0, %v2585_v17, 0.0 }
 0x1f8   : > { %2589 = vadd.xlane.f32.xlu0 %v2588_v19 }
 0x24e   : > { %v1335_v20 = vpop.xlane.xlu0 %1334 }
 0x24f   : > { %1338 = vst.msk [vmem:[%s221_s9 + $0x8] sm:$0xff] %vm1336_vm1, %v1335_v20 }
 0x252   : > { %v1332_v21 = vpop.xlane.xlu0 %1331 }
 0x253   : > { %1337 = vst.msk [vmem:[%s221_s9] sm:$0xff] %vm1336_vm1, %v1332_v21 }
 0x264   : > { %v1755_v22 = vpop.xlane.xlu1 %1754 }
 0x265   : > { %1757 = vst.msk [vmem:[%s221_s9 + $0x18] sm:$0xff] %vm1336_vm1, %v1755_v22 }
 0x268   : > { %v1752_v23 = vpop.xlane.xlu1 %1751 }
 0x269   : > { %1756 = vst.msk [vmem:[%s221_s9 + $0x10] sm:$0xff] %vm1336_vm1, %v1752_v23 }
 0x270   : > { %v2174_v24 = vpop.xlane.xlu1 %2173 }
 0x271   : > { %2176 = vst.msk [vmem:[%s221_s9 + $0x28] sm:$0xff] %vm1336_vm1, %v2174_v24 }
 0x272   : > { %v2171_v25 = vpop.xlane.xlu0 %2170 }
 0x273   : > { %2175 = vst.msk [vmem:[%s221_s9 + $0x20] sm:$0xff] %vm1336_vm1, %v2171_v25 }
 0x27f   : > { %v2593_v26 = vpop.xlane.xlu1 %2592 }
 0x280   : > { %2595 = vst.msk [vmem:[%s221_s9 + $0x38] sm:$0xff] %vm1336_vm1, %v2593_v26 }
 0x281   : > { %v2590_v27 = vpop.xlane.xlu0 %2589 }
 0x282   : > { %2594 = vst.msk [vmem:[%s221_s9 + $0x30] sm:$0xff] %vm1336_vm1, %v2590_v27 }
 0x283 PF: > { %s14_s15 = sadd.s32 1, %s3137_s15  }
 0x284   : > { %p11_p4 = scmp.ge.s32.totalorder %s14_s15, 4  }
 0x286   :  { %13 = sbr.rel (!%p11_p4) target bundleno = 1 (0x1), region = 69 }

</bundles_post_ra>
